<compile_context>
chip_gen: v6e
topology: v6e:2x2x1
jax: 0.10.0
libtpu: 0.0.40
codegen_flags: <defaults>
</compile_context>

<pallas_src>
import functools

import jax
import jax.numpy as jnp
from jax import lax
from jax.experimental import pallas as pl
from jax.experimental.pallas import tpu as pltpu


# ------------------------------- kernels ---------------------------------


def _mce_default_kernel(x_ref, t_ref, sum_ref, *, total_rows):
    """Default branch: sum over rows of sum_c(-t * log_softmax(x))."""
    i = pl.program_id(0)
    x = x_ref[...].astype(jnp.float32)          # (tn, C)
    t = t_ref[...].astype(jnp.float32)          # (tn, C)
    tn, _ = x.shape

    # Row mask for the (possibly ragged) last block; garbage rows are selected
    # away (select, not multiply, so NaN garbage cannot propagate).
    row = i * tn + lax.broadcasted_iota(jnp.int32, (tn, 1), 0)
    in_range = row < total_rows                                  # (tn, 1) bool

    m = jnp.max(x, axis=-1, keepdims=True)
    # NOTE(v5e): this exp stream is the EUP-heaviest part of the kernel; on
    # v5e it may bind before HBM.  v6e/v7x are HBM-bound.
    lse = m + jnp.log(jnp.sum(jnp.exp(x - m), axis=-1, keepdims=True))

    # sum_c(-t * (x - lse)) == lse * sum_c(t) - sum_c(t * x)
    t_sum = jnp.sum(t, axis=-1, keepdims=True)
    tx_sum = jnp.sum(t * x, axis=-1, keepdims=True)
    row_loss = lse * t_sum - tx_sum                              # (tn, 1)

    contrib = jnp.where(in_range, row_loss, jnp.float32(0.0))
    sum_ref[...] = jnp.sum(contrib, axis=0, keepdims=True)       # (1, 1)


def _mce_ignore_kernel(x_ref, t_ref, sum_ref, cnt_ref, *, ignore_index,
                       total_rows):
    """ignore_index >= 0 branch: softmax over the 'notice' columns only,
    rows with target[:, ignore_index] == 1 dropped from the mean."""
    i = pl.program_id(0)
    x = x_ref[...].astype(jnp.float32)          # (tn, C)
    t = t_ref[...].astype(jnp.float32)          # (tn, C)
    tn, c = x.shape

    row = i * tn + lax.broadcasted_iota(jnp.int32, (tn, 1), 0)
    in_range = row < total_rows                                  # (tn, 1) bool

    # (1, C) column mask, broadcast over rows (no full-tile int32 iota).
    col = lax.broadcasted_iota(jnp.int32, (1, c), 1)
    valid = col != ignore_index                                  # (1, C) bool

    # logsumexp over valid columns only; exp is taken on the masked values.
    xm = jnp.where(valid, x, jnp.float32(-1e30))
    m = jnp.max(xm, axis=-1, keepdims=True)
    e = jnp.exp(xm - m)                     # masked cols -> exp(-huge) == 0
    lse = m + jnp.log(jnp.sum(e, axis=-1, keepdims=True))

    # sum over valid cols of -t*(x - lse) == lse*sum_valid(t) - sum_valid(t*x);
    # remove the ignore column from the full-row sums instead of masking tiles.
    t_ig = t[:, ignore_index:ignore_index + 1]                   # (tn, 1)
    x_ig = x[:, ignore_index:ignore_index + 1]
    t_sum = jnp.sum(t, axis=-1, keepdims=True) - t_ig
    tx_sum = jnp.sum(t * x, axis=-1, keepdims=True) - t_ig * x_ig
    row_loss = lse * t_sum - tx_sum                              # (tn, 1)

    keep = t_ig != jnp.float32(1.0)                              # (tn, 1) bool
    valid_row = jnp.logical_and(in_range, keep)

    contrib = jnp.where(valid_row, row_loss, jnp.float32(0.0))
    sum_ref[...] = jnp.sum(contrib, axis=0, keepdims=True)       # (1, 1)
    cnt_ref[...] = jnp.sum(valid_row.astype(jnp.float32), axis=0,
                           keepdims=True)                        # (1, 1)


# --------------------------- tile-size heuristics --------------------------


def _round_up(v, m):
    return (v + m - 1) // m * m


def _sublane_multiple(dtype):
    # f32 -> 8, bf16 -> 16, int8/fp8 -> 32 (packed sublanes).
    it = jnp.dtype(dtype).itemsize
    return max(8, 8 * (4 // max(it, 1)))


def _vmem_capacity_bytes():
    try:
        info = pltpu.get_tpu_info()
        cap = getattr(info, "vmem_capacity_bytes", None)
        if cap:
            return int(cap)
    except Exception:
        pass
    return 64 << 20      # conservative fallback: v7x per-TensorCore VMEM


def _choose_block_rows(n, c, x_it, t_it, sub_mult, budget_bytes):
    c_pad = _round_up(c, 128)
    # Per-row VMEM footprint: both inputs double-buffered at their padded lane
    # width, plus ~3 full-width f32 temporaries for the upcast math.
    per_row = c_pad * (2 * (x_it + t_it) + 3 * 4)
    br = budget_bytes // max(per_row, 1)
    br = max(sub_mult, (br // sub_mult) * sub_mult)
    n_sub = _round_up(n, sub_mult)
    br = min(br, n_sub)
    # Keep >= 2 grid steps when the batch can be split, so the "parallel" grid
    # axis can be sharded across v7x's two TensorCores (free on v5e/v6e).
    if pl.cdiv(n, br) < 2 and n_sub >= 2 * sub_mult:
        half = _round_up(pl.cdiv(n, 2), sub_mult)
        if half < br:
            br = half
    return br


# ------------------------------- wrapper ----------------------------------


def multi_cross_entropy_loss(x, t, *, size_average=True, ignore_index=-100,
                             block_rows=None):
    """Pallas equivalent of MultiCrossEntropyLoss.forward(input, target)."""
    n, c = x.shape
    assert t.shape == (n, c)

    x_it = jnp.dtype(x.dtype).itemsize
    t_it = jnp.dtype(t.dtype).itemsize
    sub_mult = max(_sublane_multiple(x.dtype), _sublane_multiple(t.dtype))

    cap = _vmem_capacity_bytes()
    budget = int(cap * 0.55)           # ~35 MiB on v7x, ~70 MiB on v5e/v6e
    if block_rows is None:
        block_rows = _choose_block_rows(n, c, x_it, t_it, sub_mult, budget)
    assert block_rows % sub_mult == 0, (block_rows, sub_mult)

    num_blocks = pl.cdiv(n, block_rows)

    # vmem limit sized against the padded footprint + f32 intermediates.
    c_pad = _round_up(c, 128)
    est = block_rows * c_pad * (2 * (x_it + t_it) + 3 * 4) + (4 << 20)
    vmem_limit = int(min(max(est, 32 << 20), int(cap * 0.85)))

    cost = pl.CostEstimate(
        flops=6 * n * c,
        transcendentals=n * c,
        bytes_accessed=n * c * (x_it + t_it) + 8 * num_blocks,
    )

    in_specs = [
        pl.BlockSpec((block_rows, c), lambda i: (i, 0)),
        pl.BlockSpec((block_rows, c), lambda i: (i, 0)),
    ]
    part_shape = jax.ShapeDtypeStruct((num_blocks, 1, 1), jnp.float32)
    part_spec = pl.BlockSpec((None, 1, 1), lambda i: (i, 0, 0))
    cparams = pltpu.CompilerParams(
        dimension_semantics=("parallel",),     # independent per-block partials
        vmem_limit_bytes=vmem_limit,
    )

    if ignore_index >= 0:
        assert ignore_index < c, "ignore_index must be < number of classes"
        kernel = functools.partial(_mce_ignore_kernel,
                                   ignore_index=int(ignore_index),
                                   total_rows=n)
        sum_parts, cnt_parts = pl.pallas_call(
            kernel,
            out_shape=(part_shape, part_shape),
            grid_spec=pltpu.PrefetchScalarGridSpec(
                num_scalar_prefetch=0,
                grid=(num_blocks,),
                in_specs=in_specs,
                out_specs=(part_spec, part_spec),
            ),
            compiler_params=cparams,
            cost_estimate=cost,
        )(x, t)
        # PyTorch module always mean-reduces over kept rows in this branch
        # (size_average ignored there); NaN if every row is ignored, matching
        # the reference semantics.
        return jnp.sum(sum_parts) / jnp.sum(cnt_parts)

    kernel = functools.partial(_mce_default_kernel, total_rows=n)
    sum_parts = pl.pallas_call(
        kernel,
        out_shape=part_shape,
        grid_spec=pltpu.PrefetchScalarGridSpec(
            num_scalar_prefetch=0,
            grid=(num_blocks,),
            in_specs=in_specs,
            out_specs=part_spec,
        ),
        compiler_params=cparams,
        cost_estimate=cost,
    )(x, t)
    loss_sum = jnp.sum(sum_parts)
    if size_average:
        return loss_sum / jnp.float32(n)
    return loss_sum


# ---------------------------- pure-JAX references --------------------------


def _ref_default(x, t, size_average=True):
    logp = jax.nn.log_softmax(x, axis=1)
    out = jnp.sum(-t * logp, axis=1)
    return jnp.mean(out) if size_average else jnp.sum(out)


def _ref_ignore(x, t, ignore_index):
    c = x.shape[1]
    notice = jnp.asarray([i for i in range(c) if i != ignore_index])
    logp = jax.nn.log_softmax(x[:, notice], axis=1)
    out = jnp.sum(-t[:, notice] * logp, axis=1)
    keep = t[:, ignore_index] != 1
    return jnp.mean(out[keep])


if __name__ == "__main__":
    key = jax.random.PRNGKey(0)
    N, C = 16, 32
    kx, kt = jax.random.split(key)

    x = jax.random.normal(kx, (N, C), dtype=jnp.float32)
    # soft targets (rows sum to 1), matching typical usage of this loss
    t = jax.nn.softmax(jax.random.normal(kt, (N, C), dtype=jnp.float32), axis=1)

    # --- default branch (ignore_index=-100, size_average=True) ---
    loss = multi_cross_entropy_loss(x, t)
    jax.block_until_ready(loss)
    ref = _ref_default(x, t, size_average=True)
    assert jnp.allclose(loss, ref, rtol=1e-5, atol=1e-5), (loss, ref)

    # --- size_average=False branch ---
    loss_sum = multi_cross_entropy_loss(x, t, size_average=False)
    jax.block_until_ready(loss_sum)
    ref_sum = _ref_default(x, t, size_average=False)
    assert jnp.allclose(loss_sum, ref_sum, rtol=1e-5, atol=1e-5), (loss_sum, ref_sum)

    # --- ragged batch (exercises the cdiv grid + in-kernel row mask) ---
    x13, t13 = x[:13], t[:13]
    loss13 = multi_cross_entropy_loss(x13, t13)
    jax.block_until_ready(loss13)
    ref13 = _ref_default(x13, t13, size_average=True)
    assert jnp.allclose(loss13, ref13, rtol=1e-5, atol=1e-5), (loss13, ref13)

    # --- ignore_index >= 0 branch (rows with target[:, ig] == 1 dropped) ---
    ig = 2
    t_ig = t.at[3, :].set(0.0).at[3, ig].set(1.0)  # row 3 is ignored
    loss_ig = multi_cross_entropy_loss(x, t_ig, ignore_index=ig)
    jax.block_until_ready(loss_ig)
    ref_ig = _ref_ignore(x, t_ig, ig)
    assert jnp.allclose(loss_ig, ref_ig, rtol=1e-5, atol=1e-5), (loss_ig, ref_ig)

    # --- bf16 inputs (exercises the packed-sublane (16) block rounding) ---
    xb = x.astype(jnp.bfloat16)
    tb = t.astype(jnp.bfloat16)
    loss_bf = multi_cross_entropy_loss(xb, tb)
    jax.block_until_ready(loss_bf)
    ref_bf = _ref_default(xb.astype(jnp.float32), tb.astype(jnp.float32), True)
    assert jnp.allclose(loss_bf, ref_bf, rtol=1e-3, atol=1e-3), (loss_bf, ref_bf)

    print("KERNEL_OK")
</pallas_src>

<mosaic_0001>
module attributes {stable_mosaic.version = 11 : i64} {
  func.func @_mce_default_kernel(%arg0: i32, %arg1: memref<8x32xf32, #tpu.memory_space<vmem>>, %arg2: memref<8x32xf32, #tpu.memory_space<vmem>>, %arg3: memref<1x1x1xf32, #tpu.memory_space<vmem>>) attributes {dimension_semantics = [#tpu.dimension_semantics<parallel>], iteration_bounds = array<i64: 2>, scalar_prefetch = 0 : i64, scratch_operands = 0 : i64, tpu.core_type = #tpu.core_type<tc>, window_params = [{transform_indices = @transform_0, window_bounds = array<i64: 8, 32>}, {transform_indices = @transform_1, window_bounds = array<i64: 8, 32>}, {transform_indices = @transform_2, window_bounds = array<i64: 1, 1, 1>}]} {
    %c0 = arith.constant 0 : index
    %c0_0 = arith.constant 0 : index
    %0 = vector.load %arg1[%c0, %c0_0] : memref<8x32xf32, #tpu.memory_space<vmem>>, vector<8x32xf32>
    %c0_1 = arith.constant 0 : index
    %c0_2 = arith.constant 0 : index
    %1 = vector.load %arg2[%c0_1, %c0_2] : memref<8x32xf32, #tpu.memory_space<vmem>>, vector<8x32xf32>
    %c8_i32 = arith.constant 8 : i32
    %2 = arith.muli %arg0, %c8_i32 : i32
    %3 = tpu.iota {dimensions = array<i32: 0>} : vector<8x1xi32>
    %4 = vector.broadcast %2 : i32 to vector<8x1xi32>
    %5 = arith.addi %4, %3 : vector<8x1xi32>
    %c16_i32 = arith.constant 16 : i32
    %6 = vector.broadcast %c16_i32 : i32 to vector<8x1xi32>
    %7 = arith.cmpi slt, %5, %6 : vector<8x1xi32>
    %cst = arith.constant dense<0xFF800000> : vector<8xf32>
    %8 = vector.multi_reduction <maximumf>, %0, %cst [1] : vector<8x32xf32> to vector<8xf32>
    %9 = vector.shape_cast %8 : vector<8xf32> to vector<8x1xf32>
    %10 = vector.broadcast %9 : vector<8x1xf32> to vector<8x32xf32>
    %11 = arith.subf %0, %10 : vector<8x32xf32>
    %12 = math.exp %11 : vector<8x32xf32>
    %cst_3 = arith.constant dense<0.000000e+00> : vector<8xf32>
    %13 = vector.multi_reduction <add>, %12, %cst_3 [1] : vector<8x32xf32> to vector<8xf32>
    %14 = vector.shape_cast %13 : vector<8xf32> to vector<8x1xf32>
    %15 = math.log %14 : vector<8x1xf32>
    %16 = arith.addf %9, %15 : vector<8x1xf32>
    %cst_4 = arith.constant dense<0.000000e+00> : vector<8xf32>
    %17 = vector.multi_reduction <add>, %1, %cst_4 [1] : vector<8x32xf32> to vector<8xf32>
    %18 = vector.shape_cast %17 : vector<8xf32> to vector<8x1xf32>
    %19 = arith.mulf %1, %0 : vector<8x32xf32>
    %cst_5 = arith.constant dense<0.000000e+00> : vector<8xf32>
    %20 = vector.multi_reduction <add>, %19, %cst_5 [1] : vector<8x32xf32> to vector<8xf32>
    %21 = vector.shape_cast %20 : vector<8xf32> to vector<8x1xf32>
    %22 = arith.mulf %16, %18 : vector<8x1xf32>
    %23 = arith.subf %22, %21 : vector<8x1xf32>
    %cst_6 = arith.constant 0.000000e+00 : f32
    %24 = vector.broadcast %cst_6 : f32 to vector<8x1xf32>
    %25 = arith.select %7, %23, %24 : vector<8x1xi1>, vector<8x1xf32>
    %cst_7 = arith.constant dense<0.000000e+00> : vector<1xf32>
    %26 = vector.multi_reduction <add>, %25, %cst_7 [0] : vector<8x1xf32> to vector<1xf32>
    %27 = vector.shape_cast %26 : vector<1xf32> to vector<1x1xf32>
    %c0_8 = arith.constant 0 : index
    %c0_9 = arith.constant 0 : index
    %c0_10 = arith.constant 0 : index
    %28 = vector.load %arg3[%c0_8, %c0_9, %c0_10] : memref<1x1x1xf32, #tpu.memory_space<vmem>>, vector<1x1x1xf32>
    %29 = vector.shape_cast %28 : vector<1x1x1xf32> to vector<1x1xf32>
    %30 = vector.shape_cast %27 : vector<1x1xf32> to vector<1x1x1xf32>
    tpu.vector_store %arg3[%c0_8, %c0_9, %c0_10], %30 {strides = array<i32>} : memref<1x1x1xf32, #tpu.memory_space<vmem>>, vector<1x1x1xf32>,
    return
  }
  func.func @transform_0(%arg0: i32) -> (i32, i32) {
    %c0_i32 = arith.constant 0 : i32
    %c0_i32_0 = arith.constant 0 : i32
    return %arg0, %c0_i32 : i32, i32
  }
  func.func @transform_1(%arg0: i32) -> (i32, i32) {
    %c0_i32 = arith.constant 0 : i32
    %c0_i32_0 = arith.constant 0 : i32
    return %arg0, %c0_i32 : i32, i32
  }
  func.func @transform_2(%arg0: i32) -> (i32, i32, i32) {
    %c0_i32 = arith.constant 0 : i32
    %c0_i32_0 = arith.constant 0 : i32
    %c0_i32_1 = arith.constant 0 : i32
    return %arg0, %c0_i32, %c0_i32_0 : i32, i32, i32
  }
}

</mosaic_0001>

<bundles_post_ra>
// kernel: tpu_custom_call.1
= control target key start
LH: loop header
LB: loop body
LE: loop exit
PB: predicated region body
PF: predicated region fallthrough
CT: control target
= control target key end

     0   :  { %7 = vsyncpa [#allocation3], 0  ;;  %s642_s0 = inlined_call_operand.hbm [shape: f32[16,32], index: 0, kind: input, shape index: {}]   ;;  %s643_s1 = inlined_call_operand.hbm [shape: f32[16,32], index: 1, kind: input, shape index: {}]   ;;  %s644_s2 = inlined_call_operand.vmem [shape: f32[2,1,1], index: 2, kind: output, shape index: {}]  }
   0x1   :  { %9 = vsyncpa [#allocation3 + $0x1], 0 }
   0x2   :  { %10 = vsyncpa [#allocation5], 0 }
   0x3   :  { %12 = vsyncpa [#allocation5 + $0x1], 0  ;;  %s489_s9 = smov 0   ;;  %s491_s10 = smov 0  }
   0x4   :  { %s493_s11 = smov 0   ;;  %s495_s12 = smov 0  }
   0x5 LB: > { %s508_s13 = sadd.s32 4294967295, %s470_s12   ;;  %s511_s14 = sadd.s32 1, %s470_s12   ;;  %s470_s12 = sphi %s495_s12, %s656_s12   ;;  %s466_s11 = sphi %s493_s11, %s655_s11   ;;  %s462_s10 = sphi %s491_s10, %s654_s10   ;;  %s458_s9 = sphi %s489_s9, %s653_s9  }
   0x6   : > { %s22_s15 = ssub.s32 %s470_s12, %s511_s14  ;;  %s25_s16 = sadd.s32 1, %s466_s11 }
   0x7   : > { %p23_p0 = scmp.eq.s32.totalorder %s22_s15, 0  ;;  %p32_p1 = scmp.ne.s32.totalorder %s466_s11, %s462_s10 }
   0x8   : > { %p33_p2 = scmp.eq.s32.totalorder %s470_s12, 0  ;;  %p38_p3 = scmp.ne.s32.totalorder %s462_s10, %s458_s9 }
   0x9   : > { %s521_s17 = scalar_select %p23_p0, %s466_s11, %s25_s16  }
   0xa   : > { %p34_p4 = por %p33_p2, %p32_p1  ;;  %p39_p5 = scmp.eq.s32.totalorder %s508_s13, 0 }
   0xb   : > { %p339_p6 = scmp.lt.s32.totalorder %s470_s12, 2  ;;  %s530_s19 = sand.u32 1, %s466_s11  }
   0xc   : > { %p525_p7 = por %p39_p5, %p38_p3  ;;  %s318_s20 = sshll.u32 %s530_s19, 3 }
   0xd   : > { %s319_s21 = sshll.u32 %s470_s12, 7  ;;  %s118_s25 = scalar_lea.vmem [#allocation2], %s318_s20 }
   0xe   : > { %s646_s18 = scalar_select %p525_p7, 1, 0 }
   0xf   : > { %s539_s24 = scalar_lea.hbm %s642_s0, %s319_s21  ;;  %s125_s26 = sshll.u32 %s118_s25, 4  ;;  %s543_s26 = int_to_ptr.vmem [resolvable:$true] %s125_s26 }
  0x10   : > { %p545_p8 = pnand %p339_p6, %p34_p4  ;;  %s115_s28 = scalar_lea.sflag [#allocation3], %s530_s19 }
  0x11   : > { %s376_s29 = scalar_lea.hbm %s539_s24, 128  ;;  %s381_s4 = scalar_lea.hbm %s642_s0, 256 }
  0x12   : > { %p377_p11 = scmp.ne.s32.totalorder %s539_s24, %s376_s29  ;;  %p378_p12 = pneg %p545_p8 }
  0x13   : > { %p382_p1 = scmp.lt.s32.totalorder %s539_s24, %s642_s0  ;;  %p383_p2 = scmp.lt.s32.totalorder %s381_s4, %s376_s29 }
  0x14   : > { %p379_p13 = pnand %p378_p12, %p377_p11 }
  0x15   : > { %p384_p3 = por %p383_p2, %p382_p1 }
  0x16   : > { %p380_p0 = pneg %p379_p13 }
  0x18   : > { %p385_p4 = pnand %p384_p3, %p380_p0 }
  0x1a   : > { %388 = shalt.err (!%p385_p4)
}
  0x1b   : > { %s389_s7 = scalar_lea.vmem %s543_s26, 128  ;;  %s472_s8 = smov [#allocation2]  }
  0x1c   : > { %p390_p5 = scmp.ne.s32.totalorder %s543_s26, %s389_s7  ;;  %s394_s9 = sshll.u32 %s472_s8, 4  ;;  %s395_s9 = int_to_ptr.vmem [resolvable:$false] %s394_s9 }
  0x1d   : > { %s396_s15 = scalar_lea.vmem %s395_s9, 256  ;;  %p397_p13 = scmp.lt.s32.totalorder %s543_s26, %s395_s9 }
  0x1e   : > { %p392_p6 = pnand %p390_p5, %p378_p12  ;;  %p398_p9 = scmp.lt.s32.totalorder %s396_s15, %s389_s7 }
  0x20   : > { %p393_p11 = pneg %p392_p6  ;;  %p399_p10 = por %p398_p9, %p397_p13 }
  0x22   : > { %p400_p1 = pnand %p399_p10, %p393_p11 }
  0x24   : > { %403 = shalt.err (!%p400_p1)
}
  0x25   : > { %335 = dma.hbm_to_vmem [thread:$0]  (!%p545_p8), %s539_s24, 128, %s543_s26, %s115_s28  }
  0x26   : > { %p648_p0 = scmp.lt.s32.totalorder %s470_s12, 3  ;;  %p649_p2 = scmp.ge.s32.totalorder %s470_s12, 1 }
  0x27   : > { %s589_s25 = scalar_lea.hbm %s643_s1, %s319_s21  ;;  %s136_s29 = scalar_lea.vmem [#allocation4], %s318_s20 }
  0x28   : > { %p580_p3 = pnand %p649_p2, %p648_p0  ;;  %s143_s30 = sshll.u32 %s136_s29, 4  ;;  %s144_s30 = int_to_ptr.vmem [resolvable:$true] %s143_s30 }
  0x29   : > { %s133_s24 = scalar_lea.sflag [#allocation5], %s530_s19  ;;  %s404_s26 = scalar_lea.hbm %s589_s25, 128 }
  0x2a   : > { %s650_s16 = scalar_select %p580_p3, 1, 0 }
  0x2b   : > { %p405_p9 = scmp.ne.s32.totalorder %s589_s25, %s404_s26  ;;  %s409_s3 = scalar_lea.hbm %s643_s1, 256 }
  0x2c   : > { %p410_p5 = scmp.lt.s32.totalorder %s589_s25, %s643_s1  ;;  %p411_p6 = scmp.lt.s32.totalorder %s409_s3, %s404_s26 }
  0x2d   : > { %p407_p10 = pnand %p405_p9, %p378_p12 }
  0x2e   : > { %p412_p11 = por %p411_p6, %p410_p5 }
  0x2f   : > { %p408_p4 = pneg %p407_p10 }
  0x31   : > { %p413_p13 = pnand %p412_p11, %p408_p4 }
  0x33   : > { %416 = shalt.err (!%p413_p13)
}
  0x34   : > { %s417_s20 = scalar_lea.vmem %s144_s30, 128  ;;  %s473_s19 = smov [#allocation4]  }
  0x35   : > { %p418_p1 = scmp.ne.s32.totalorder %s144_s30, %s417_s20  ;;  %s422_s5 = sshll.u32 %s473_s19, 4  ;;  %s423_s5 = int_to_ptr.vmem [resolvable:$false] %s422_s5 }
  0x36   : > { %s424_s6 = scalar_lea.vmem %s423_s5, 256  ;;  %p425_p9 = scmp.lt.s32.totalorder %s144_s30, %s423_s5 }
  0x37   : > { %p420_p0 = pnand %p418_p1, %p378_p12  ;;  %p426_p10 = scmp.lt.s32.totalorder %s424_s6, %s417_s20 }
  0x39   : > { %p421_p2 = pneg %p420_p0  ;;  %p427_p7 = por %p426_p10, %p425_p9 }
  0x3b   : > { %p428_p3 = pnand %p427_p7, %p421_p2 }
  0x3d   : > { %431 = shalt.err (!%p428_p3)
}
  0x3e   : > { %338 = dma.hbm_to_vmem [thread:$0]  (!%p545_p8), %s589_s25, 128, %s144_s30, %s133_s24  }
  0x3f   : > { %p651_p4 = scmp.ne.s32.totalorder %s650_s16, 0 }
  0x40   : > { %s154_s7 = sand.u32 (!%p651_p4), 1, %s462_s10   ;;  %p652_p12 = scmp.ne.s32.totalorder (!%p651_p4), %s646_s18, 0 }
  0x41   : > { %152 = sbr.rel (%p651_p4) target bundleno = 406 (0x196), region = 28  ;;  %s323_s8 = sshll.u32 (!%p651_p4), %s154_s7, 3 }
  0x42   : > { %s155_s9 = scalar_lea.sflag (!%p651_p4), [#allocation3], %s154_s7  ;;  %s158_s15 = scalar_lea.vmem (!%p651_p4), [#allocation2], %s323_s8 }
  0x46   : > { %449 = dma.done.wait (%p652_p12), %s155_s9, 128  }
  0x47   : > { %451 = vsyncadd (%p652_p12), %s155_s9, 4294967168  ;;  %s164_s22 = scalar_lea.sflag [#allocation5], %s154_s7  ;;  %s167_s23 = scalar_lea.vmem [#allocation4], %s323_s8 }
  0x48   : > { %453 = dma.done.wait (%p652_p12), %s164_s22, 128  }
  0x49   : > { %455 = vsyncadd (%p652_p12), %s164_s22, 4294967168  ;;  %vm202_vm0 = vcmask 261120   ;;  %v194_v0 = vld [vmem:[%s158_s15] sm:$0xff]  ;;  %v195_v2 = vld [vmem:[%s167_s23] sm:$0xff]  ;;  %v197_v12 = vlaneseq  ;;  %s325_s18 = sshll.u32 %s508_s13, 3  ;;  %p191_p7 = scmp.lt.s32.totalorder %s508_s13, 1 }
  0x4a   : > { %v203_v1 = vsel %vm202_vm0, %v194_v0, -inf  ;;  %v215_v3 = vsel %vm202_vm0, %v195_v2, 0.0  ;;  %v218_v4 = vmul.f32 %v195_v2, %v194_v0  ;;  %v199_v15 = vstv %s325_s18 }
  0x4b   : > { %204 = vmax.xlane.f32.xlu0 %v203_v1  ;;  %216 = vadd.xlane.f32.xlu1 %v215_v3  ;;  %v198_v14 = vshrl.u32 %v197_v12, 7  ;;  %s658_s13 = smov (!%p191_p7, %s508_s13), 1  ;;  %vm231_vm2 = vcmask 0  }
  0x4c   : > { %v219_v5 = vsel %vm202_vm0, %v218_v4, 0.0  ;;  %s193_s25 = scalar_lea.vmem %s644_s2, %s658_s13 }
  0x4d   : > { %v200_v18 = vadd.s32 %v199_v15, %v198_v14 }
  0x4f   : > { %220 = vadd.xlane.f32.xlu1 %v219_v5  ;;  %vm201_vm1 = vcmp.lt.s32.totalorder %v200_v18, 16 }
  0xd4   : > { %v205_v6 = vpop.xlane.xlu0 %204  ;;  %v217_v13 = vpop.xlane.xlu1 %216 }
  0xd5   : > { %v206_v7 = vsub.f32 %v194_v0, %v205_v6 }
  0xd7   : > { %v207_v8 = vmul.f32 1.442695, %v206_v7 }
  0xd8   : > { %v221_v20 = vpop.xlane.xlu1 %220 }
  0xd9   : > { %372 = vpow2.f32 %v207_v8 }
  0xe6   : > { %v373_v9 = vpop.eup %372 }
  0xe7   : > { %v209_v10 = vsel %vm202_vm0, %v373_v9, 0.0 }
  0xe8   : > { %210 = vadd.xlane.f32.xlu0 %v209_v10 }
 0x171   : > { %v211_v11 = vpop.xlane.xlu0 %210 }
 0x172   : > { %374 = vlog2.f32 %v211_v11 }
 0x17f   : > { %v375_v16 = vpop.eup %374 }
 0x180   : > { %v213_v17 = vmul.f32 0.6931472, %v375_v16 }
 0x182   : > { %v214_v19 = vadd.f32 %v213_v17, %v205_v6 }
 0x184   : > { %v222_v21 = vmul.f32 %v217_v13, %v214_v19 }
 0x186   : > { %v223_v22 = vsub.f32 %v222_v21, %v221_v20 }
 0x188   : > { %v224_v23 = vsel %vm201_vm1, %v223_v22, 0.0 }
 0x189   : > { %v225_v24 = vrot.slane %v224_v23, 4 }
 0x18b   : > { %v226_v25 = vadd.f32 %v225_v24, %v224_v23 }
 0x18d   : > { %v227_v26 = vrot.slane %v226_v25, 2 }
 0x18f   : > { %v228_v27 = vadd.f32 %v227_v26, %v226_v25 }
 0x191   : > { %v229_v28 = vrot.slane %v228_v27, 1 }
 0x193   : > { %v230_v29 = vadd.f32 %v229_v28, %v228_v27 }
 0x195   : > { %232 = vst.msk [vmem:[%s193_s25] sm:$0x1] %vm231_vm2, %v230_v29 }
 0x196 PF: > { %p15_p8 = scmp.ge.s32.totalorder %s511_s14, 4   ;;  %s653_s9 = smov %s462_s10 }
 0x197   : > { %s654_s10 = smov %s466_s11  ;;  %s655_s11 = smov %s521_s17 }
 0x198   : > { %s656_s12 = smov %s511_s14  ;;  %17 = sbr.rel (!%p15_p8) target bundleno = 5 (0x5), region = 81 }
 0x19d   :  { %250 = vsyncpa [#allocation3], 1 }
 0x19e   :  { %252 = vsyncpa [#allocation3 + $0x1], 1 }
 0x19f   :  { %253 = vsyncpa [#allocation5], 1 }
 0x1a0   :  { %255 = vsyncpa [#allocation5 + $0x1], 1 }

</bundles_post_ra>
